<compile_context>
chip_gen: v7x
topology: tpu7x:2x2x1
jax: 0.10.0
libtpu: 0.0.40
codegen_flags: <defaults>
</compile_context>

<pallas_src>
import functools

import jax
import jax.numpy as jnp
from jax import lax
from jax.experimental import pallas as pl
from jax.experimental.pallas import tpu as pltpu


_LANE = 128
_SUBLANE = 8
# Conservative: padded table (plus double-buffered tiles) must stay well under
# v7x's 64 MiB physical VMEM (default scoped limits are 16/32/32 MiB).
_MATMUL_TABLE_BYTE_BUDGET = 14 * 1024 * 1024
_MATMUL_MAX_SEQ = 64           # histogram build is an unrolled S-step VPU loop
_GATHER_TOKENS_PER_STEP = 8    # embedding rows gathered per grid step
_GATHER_BUFFER_DEPTH = 3       # DMA pipelining depth for the row gathers


def prepare_embedding(emb_table):
    """Pad the embedding table once at parameter-init time (hoisted out of forward).

    Rows -> multiple of 128 with at least one trailing all-zero row (used as the
    "padding token" for sequence padding in the gather path).  Cols -> multiple
    of 128 so every row DMA / output store is lane-dense (no masked vst).
    """
    v, d = emb_table.shape
    v_pad = pl.cdiv(v + 1, _LANE) * _LANE
    d_pad = pl.cdiv(d, _LANE) * _LANE
    return jnp.pad(emb_table.astype(jnp.float32),
                   ((0, v_pad - v), (0, d_pad - d)))


# ---------------------------------------------------------------------------
# MATMUL path: histogram(B, V) @ table on the MXU, table resident in VMEM.
# ---------------------------------------------------------------------------
def _matmul_kernel(ids_ref, tab_ref, out_ref, *, seq_len, v_pad, inv_s):
    ids = ids_ref[...]                                        # (TB, S) int32
    tb = ids.shape[0]
    v_iota = lax.broadcasted_iota(jnp.int32, (tb, v_pad), 1)  # hoisted out of loop
    counts = jnp.zeros((tb, v_pad), jnp.float32)
    for s in range(seq_len):                                  # static unroll: VPU cmp+add
        counts = counts + (ids[:, s:s + 1] == v_iota).astype(jnp.float32)
    # One MXU matmul per batch tile: (TB, V_pad) @ (V_pad, D_pad), f32 accumulate.
    out_ref[...] = jnp.dot(counts, tab_ref[...],
                           preferred_element_type=jnp.float32) * inv_s


def _forward_matmul(ids32, table_padded, emb_size, inv_s):
    batch, seq = ids32.shape
    v_pad, d_pad = table_padded.shape
    # Batch tile: multiple of 8 sublanes.  For large batches raise toward 128
    # (v5e-native MXU) / 256 (v6e & v7x native) to amortize MXU push/pop.
    tb = _SUBLANE if batch <= _SUBLANE else 128
    b_pad = pl.cdiv(batch, tb) * tb
    ids_b = jnp.pad(ids32, ((0, b_pad - batch), (0, 0)))      # pad rows sliced off below

    kernel = functools.partial(_matmul_kernel, seq_len=seq, v_pad=v_pad, inv_s=inv_s)
    out = pl.pallas_call(
        kernel,
        out_shape=jax.ShapeDtypeStruct((b_pad, d_pad), jnp.float32),
        grid_spec=pltpu.PrefetchScalarGridSpec(
            num_scalar_prefetch=0,
            grid=(b_pad // tb,),
            in_specs=[
                pl.BlockSpec((tb, seq), lambda i: (i, 0)),
                # Full table as a single VMEM block; constant block index, so it
                # is fetched once and stays resident across all batch tiles.
                pl.BlockSpec((v_pad, d_pad), lambda i: (0, 0)),
            ],
            out_specs=pl.BlockSpec((tb, d_pad), lambda i: (i, 0)),
        ),
        compiler_params=pltpu.CompilerParams(
            dimension_semantics=("parallel",),
            vmem_limit_bytes=48 * 1024 * 1024,   # headroom under v7x's 64 MiB
        ),
    )(ids_b, table_padded)
    return out[:batch, :emb_size]


# ---------------------------------------------------------------------------
# GATHER path: scalar-prefetch driven row gather, T rows per grid step.
# ---------------------------------------------------------------------------
def _gather_kernel(ids_smem, *refs, tokens_per_step, inv_s):
    del ids_smem                               # only consumed by the index_maps
    row_refs = refs[:tokens_per_step]          # T x (1, 1, D_pad) gathered rows
    out_ref = refs[tokens_per_step]            # (1, 1, D_pad) VMEM-resident accumulator
    sc = pl.program_id(1)

    @pl.when(sc == 0)
    def _init():
        out_ref[...] = jnp.zeros_like(out_ref)

    acc = row_refs[0][...]
    for r in row_refs[1:]:
        acc = acc + r[...]
    out_ref[...] += acc

    @pl.when(sc == pl.num_programs(1) - 1)
    def _finalize():
        out_ref[...] = out_ref[...] * inv_s
    # TODO(synk): self.layers is an empty nn.ModuleList, so there are no
    # feedforward layers after the mean -- that part of forward is the identity.


def _make_gather_index_map(k, tokens_per_step, seq_pad):
    def index_map(b, sc, ids_ref):
        return (ids_ref[b * seq_pad + sc * tokens_per_step + k], 0, 0)
    return index_map


def _gather_in_spec(d_pad, index_map):
    # Deeper-than-default buffering keeps more tiny row DMAs in flight (these
    # gathers are pure DMA latency with ~no compute to hide behind).  Fall back
    # to default double-buffering if this JAX build lacks the kwarg.
    try:
        return pl.BlockSpec((1, 1, d_pad), index_map,
                            pipeline_mode=pl.Buffered(_GATHER_BUFFER_DEPTH))
    except (TypeError, AttributeError):
        return pl.BlockSpec((1, 1, d_pad), index_map)


def _forward_gather(ids32, table_padded, vocab_size, emb_size, inv_s):
    batch, seq = ids32.shape
    v_pad, d_pad = table_padded.shape
    t = _GATHER_TOKENS_PER_STEP
    seq_pad = pl.cdiv(seq, t) * t
    # Sequence padding points at the guaranteed all-zero row `vocab_size`, so
    # padded positions add nothing to the sum (divisor stays 1/seq).
    if seq_pad != seq:
        ids32 = jnp.pad(ids32, ((0, 0), (0, seq_pad - seq)),
                        constant_values=vocab_size)
    ids_flat = ids32.reshape(-1)               # 1D ids => no (8,128) SMEM pad-bloat

    table3d = table_padded.reshape(v_pad, 1, d_pad)   # metadata-only unit-dim reshape

    kernel = functools.partial(_gather_kernel, tokens_per_step=t, inv_s=inv_s)
    in_specs = [
        _gather_in_spec(d_pad, _make_gather_index_map(k, t, seq_pad))
        for k in range(t)
    ]
    out = pl.pallas_call(
        kernel,
        out_shape=jax.ShapeDtypeStruct((batch, 1, d_pad), jnp.float32),
        grid_spec=pltpu.PrefetchScalarGridSpec(
            num_scalar_prefetch=1,                       # ids -> SMEM, drive the gathers
            grid=(batch, seq_pad // t),
            in_specs=in_specs,
            out_specs=pl.BlockSpec((1, 1, d_pad), lambda b, sc, ids: (b, 0, 0)),
        ),
        compiler_params=pltpu.CompilerParams(
            dimension_semantics=("parallel", "arbitrary"),
        ),
    )(ids_flat, *([table3d] * t))
    return out.reshape(batch, d_pad)[:, :emb_size]


# ---------------------------------------------------------------------------
# Public forward (path selection) and pure-JAX reference.
# ---------------------------------------------------------------------------
@functools.partial(jax.jit,
                   static_argnames=("vocab_size", "emb_size", "force_path"))
def dan_forward(ids, table_padded, *, vocab_size, emb_size, force_path="auto"):
    """DanModel.forward: mean over the sequence of embedding rows.

    ids:          (B, S) integer token ids
    table_padded: (V_pad, D_pad) float32 from prepare_embedding()
    returns:      (B, emb_size) float32 == torch.mean(embedding(x), dim=1)
    """
    batch, seq = ids.shape
    v_pad, d_pad = table_padded.shape
    if seq == 0:
        raise ValueError("DanModel forward needs seq_length >= 1")

    # TODO(synk): torch.nn.Embedding raises on out-of-range ids; here they are
    # clamped into range instead of erroring.
    ids32 = jnp.clip(ids.astype(jnp.int32), 0, vocab_size - 1)
    inv_s = 1.0 / seq

    table_bytes = v_pad * d_pad * 4
    use_matmul = (table_bytes <= _MATMUL_TABLE_BYTE_BUDGET
                  and seq <= _MATMUL_MAX_SEQ)
    if force_path == "matmul":
        use_matmul = True
    elif force_path == "gather":
        use_matmul = False

    if use_matmul:
        return _forward_matmul(ids32, table_padded, emb_size, inv_s)
    return _forward_gather(ids32, table_padded, vocab_size, emb_size, inv_s)


def dan_reference(ids, emb_table):
    gathered = jnp.take(emb_table, ids, axis=0)   # (B, S, D)
    return jnp.mean(gathered, axis=1)             # (B, D)


if __name__ == "__main__":
    # Small deterministic shapes consistent with the module.
    vocab_size = 64     # len(vocab)
    emb_size = 32       # args.emb_size
    batch = 2
    seq_len = 8

    key = jax.random.PRNGKey(0)
    k_emb, k_ids = jax.random.split(key)

    # nn.Embedding default init ~ N(0, 1); deterministic synthetic weights here.
    emb_table = jax.random.normal(k_emb, (vocab_size, emb_size), dtype=jnp.float32)
    ids = jax.random.randint(k_ids, (batch, seq_len), 0, vocab_size, dtype=jnp.int32)

    # Padding hoisted to "parameter init" time: done once, outside the forward.
    table_padded = prepare_embedding(emb_table)

    ref = dan_reference(ids, emb_table)

    # Auto path (table fits VMEM -> histogram @ table MXU matmul).
    out = dan_forward(ids, table_padded, vocab_size=vocab_size, emb_size=emb_size)
    out = jax.block_until_ready(out)
    assert out.shape == (batch, emb_size)
    assert jnp.allclose(out, ref, atol=1e-5, rtol=1e-5), "matmul path mismatch"

    # Large-vocab fallback path (scalar-prefetch row gather, 8 rows per step).
    out_g = dan_forward(ids, table_padded, vocab_size=vocab_size,
                        emb_size=emb_size, force_path="gather")
    out_g = jax.block_until_ready(out_g)
    assert out_g.shape == (batch, emb_size)
    assert jnp.allclose(out_g, ref, atol=1e-5, rtol=1e-5), "gather path mismatch"

    print("KERNEL_OK")
</pallas_src>

<mosaic_0001>
module attributes {stable_mosaic.version = 11 : i64} {
  func.func @_matmul_kernel(%arg0: i32, %arg1: memref<8x8xi32, #tpu.memory_space<vmem>>, %arg2: memref<128x128xf32, #tpu.memory_space<vmem>>, %arg3: memref<8x128xf32, #tpu.memory_space<vmem>>) attributes {dimension_semantics = [#tpu.dimension_semantics<parallel>], iteration_bounds = array<i64: 1>, scalar_prefetch = 0 : i64, scratch_operands = 0 : i64, tpu.core_type = #tpu.core_type<tc>, window_params = [{transform_indices = @transform_0, window_bounds = array<i64: 8, 8>}, {pipeline_mode = #tpu.pipeline_mode<synchronous>, transform_indices = @transform_1, window_bounds = array<i64: 128, 128>}, {transform_indices = @transform_2, window_bounds = array<i64: 8, 128>}]} {
    %c0 = arith.constant 0 : index
    %c0_0 = arith.constant 0 : index
    %0 = vector.load %arg1[%c0, %c0_0] : memref<8x8xi32, #tpu.memory_space<vmem>>, vector<8x8xi32>
    %1 = tpu.iota {dimensions = array<i32: 1>} : vector<8x128xi32>
    %cst = arith.constant 0.000000e+00 : f32
    %2 = vector.broadcast %cst : f32 to vector<8x128xf32>
    %3 = vector.extract_strided_slice %0 {offsets = [0, 0], sizes = [8, 1], strides = [1, 1]} : vector<8x8xi32> to vector<8x1xi32>
    %4 = vector.broadcast %3 : vector<8x1xi32> to vector<8x128xi32>
    %5 = arith.cmpi eq, %4, %1 : vector<8x128xi32>
    %6 = arith.extui %5 : vector<8x128xi1> to vector<8x128xi32>
    %7 = arith.sitofp %6 : vector<8x128xi32> to vector<8x128xf32>
    %8 = arith.addf %2, %7 : vector<8x128xf32>
    %9 = vector.extract_strided_slice %0 {offsets = [0, 1], sizes = [8, 1], strides = [1, 1]} : vector<8x8xi32> to vector<8x1xi32>
    %10 = vector.broadcast %9 : vector<8x1xi32> to vector<8x128xi32>
    %11 = arith.cmpi eq, %10, %1 : vector<8x128xi32>
    %12 = arith.extui %11 : vector<8x128xi1> to vector<8x128xi32>
    %13 = arith.sitofp %12 : vector<8x128xi32> to vector<8x128xf32>
    %14 = arith.addf %8, %13 : vector<8x128xf32>
    %15 = vector.extract_strided_slice %0 {offsets = [0, 2], sizes = [8, 1], strides = [1, 1]} : vector<8x8xi32> to vector<8x1xi32>
    %16 = vector.broadcast %15 : vector<8x1xi32> to vector<8x128xi32>
    %17 = arith.cmpi eq, %16, %1 : vector<8x128xi32>
    %18 = arith.extui %17 : vector<8x128xi1> to vector<8x128xi32>
    %19 = arith.sitofp %18 : vector<8x128xi32> to vector<8x128xf32>
    %20 = arith.addf %14, %19 : vector<8x128xf32>
    %21 = vector.extract_strided_slice %0 {offsets = [0, 3], sizes = [8, 1], strides = [1, 1]} : vector<8x8xi32> to vector<8x1xi32>
    %22 = vector.broadcast %21 : vector<8x1xi32> to vector<8x128xi32>
    %23 = arith.cmpi eq, %22, %1 : vector<8x128xi32>
    %24 = arith.extui %23 : vector<8x128xi1> to vector<8x128xi32>
    %25 = arith.sitofp %24 : vector<8x128xi32> to vector<8x128xf32>
    %26 = arith.addf %20, %25 : vector<8x128xf32>
    %27 = vector.extract_strided_slice %0 {offsets = [0, 4], sizes = [8, 1], strides = [1, 1]} : vector<8x8xi32> to vector<8x1xi32>
    %28 = vector.broadcast %27 : vector<8x1xi32> to vector<8x128xi32>
    %29 = arith.cmpi eq, %28, %1 : vector<8x128xi32>
    %30 = arith.extui %29 : vector<8x128xi1> to vector<8x128xi32>
    %31 = arith.sitofp %30 : vector<8x128xi32> to vector<8x128xf32>
    %32 = arith.addf %26, %31 : vector<8x128xf32>
    %33 = vector.extract_strided_slice %0 {offsets = [0, 5], sizes = [8, 1], strides = [1, 1]} : vector<8x8xi32> to vector<8x1xi32>
    %34 = vector.broadcast %33 : vector<8x1xi32> to vector<8x128xi32>
    %35 = arith.cmpi eq, %34, %1 : vector<8x128xi32>
    %36 = arith.extui %35 : vector<8x128xi1> to vector<8x128xi32>
    %37 = arith.sitofp %36 : vector<8x128xi32> to vector<8x128xf32>
    %38 = arith.addf %32, %37 : vector<8x128xf32>
    %39 = vector.extract_strided_slice %0 {offsets = [0, 6], sizes = [8, 1], strides = [1, 1]} : vector<8x8xi32> to vector<8x1xi32>
    %40 = vector.broadcast %39 : vector<8x1xi32> to vector<8x128xi32>
    %41 = arith.cmpi eq, %40, %1 : vector<8x128xi32>
    %42 = arith.extui %41 : vector<8x128xi1> to vector<8x128xi32>
    %43 = arith.sitofp %42 : vector<8x128xi32> to vector<8x128xf32>
    %44 = arith.addf %38, %43 : vector<8x128xf32>
    %45 = vector.extract_strided_slice %0 {offsets = [0, 7], sizes = [8, 1], strides = [1, 1]} : vector<8x8xi32> to vector<8x1xi32>
    %46 = vector.broadcast %45 : vector<8x1xi32> to vector<8x128xi32>
    %47 = arith.cmpi eq, %46, %1 : vector<8x128xi32>
    %48 = arith.extui %47 : vector<8x128xi1> to vector<8x128xi32>
    %49 = arith.sitofp %48 : vector<8x128xi32> to vector<8x128xf32>
    %50 = arith.addf %44, %49 : vector<8x128xf32>
    %c0_1 = arith.constant 0 : index
    %c0_2 = arith.constant 0 : index
    %51 = vector.load %arg2[%c0_1, %c0_2] : memref<128x128xf32, #tpu.memory_space<vmem>>, vector<128x128xf32>
    %cst_3 = arith.constant dense<0.000000e+00> : vector<8x128xf32>
    %52 = tpu.matmul %50, %51, %cst_3 {dimension_numbers = #tpu.dot_dimension_numbers<[1], [0], [0], [1], [0, 0, 1, 1], [], []>} : vector<8x128xf32>, vector<128x128xf32>, vector<8x128xf32> -> vector<8x128xf32>
    %cst_4 = arith.constant 1.250000e-01 : f32
    %53 = vector.broadcast %cst_4 : f32 to vector<8x128xf32>
    %54 = arith.mulf %52, %53 : vector<8x128xf32>
    %c0_5 = arith.constant 0 : index
    %c0_6 = arith.constant 0 : index
    %55 = vector.load %arg3[%c0_5, %c0_6] : memref<8x128xf32, #tpu.memory_space<vmem>>, vector<8x128xf32>
    tpu.vector_store %arg3[%c0_5, %c0_6], %54 {strides = array<i32>} : memref<8x128xf32, #tpu.memory_space<vmem>>, vector<8x128xf32>,
    return
  }
  func.func @transform_0(%arg0: i32) -> (i32, i32) {
    %c0_i32 = arith.constant 0 : i32
    %c0_i32_0 = arith.constant 0 : i32
    return %arg0, %c0_i32 : i32, i32
  }
  func.func @transform_1(%arg0: i32) -> (i32, i32) {
    %c0_i32 = arith.constant 0 : i32
    %c0_i32_0 = arith.constant 0 : i32
    %c0_i32_1 = arith.constant 0 : i32
    return %c0_i32, %c0_i32_0 : i32, i32
  }
  func.func @transform_2(%arg0: i32) -> (i32, i32) {
    %c0_i32 = arith.constant 0 : i32
    %c0_i32_0 = arith.constant 0 : i32
    return %arg0, %c0_i32 : i32, i32
  }
}

</mosaic_0001>

<bundles_post_ra>
// kernel: dan_forward.1
= control target key start
LH: loop header
LB: loop body
LE: loop exit
PB: predicated region body
PF: predicated region fallthrough
CT: control target
= control target key end

     0   :  { %7 = vsyncpa [#allocation3], 0  ;;  %s308_s9 = smov [#allocation2]   ;;  %s363_s0 = inlined_call_operand.vmem [shape: s32[8,8], index: 0, kind: input, shape index: {}]   ;;  %s364_s1 = inlined_call_operand.hbm [shape: f32[128,128], index: 1, kind: input, shape index: {}]   ;;  %s365_s2 = inlined_call_operand.vmem [shape: f32[8,128], index: 2, kind: output, shape index: {}]  }
   0x1   :  { %s15_s10 = sshll.u32 %s308_s9, 4  ;;  %s284_s13 = scalar_lea.hbm %s364_s1, 2048  ;;  %s16_s10 = int_to_ptr.vmem [resolvable:$true] %s15_s10 }
   0x2   :  { %p285_p0 = scmp.ne.s32.totalorder %s364_s1, %s284_s13  ;;  %p288_p1 = scmp.lt.u32.totalorder %s284_s13, %s364_s1 }
   0x4   :  { %p290_p2 = pnand %p288_p1, %p285_p0 }
   0x6   :  { %293 = shalt.err (!%p290_p2)
}
   0x7   :  { %s294_s18 = scalar_lea.vmem %s16_s10, 2048  ;;  %p299_p4 = scmp.lt.s32.totalorder %s16_s10, %s16_s10 }
   0x8   :  { %p295_p3 = scmp.ne.s32.totalorder %s16_s10, %s294_s18  ;;  %p300_p5 = scmp.lt.s32.totalorder %s294_s18, %s294_s18 }
   0xa   :  { %p301_p6 = por %p300_p5, %p299_p4 }
   0xc   :  { %p302_p7 = pnand %p301_p6, %p295_p3 }
   0xe   :  { %305 = shalt.err (!%p302_p7)
}
   0xf   :  { %s309_s19 = smov 128   ;;  %s310_s20 = smov 8  }
  0x10   :  { %21 = dma.hbm_to_vmem [thread:$0]  %s364_s1, 2048, %s16_s10, [#allocation3], %s309_s19, %s309_s19, %s310_s20  }
  0x11   :  { %306 = dma.done.wait [#allocation3], 2048  }
  0x12   :  { %307 = vsyncadd [#allocation3], 4294965248  ;;  %v311_v0 = vmov 2   ;;  %v312_v1 = vmov 0   ;;  %v313_v2 = vmov 0.0|0.0   ;;  %v25_v3 = vld [vmem:[%s363_s0] sm:$0xff]  ;;  %v26_v35 = vlaneseq }
  0x13   :  { %277 = vset.pattern.permute.xlu1 %v311_v0  ;;  %275 = vset.pattern.permute.xlu0 %v312_v1  ;;  %v84_v4 = vld [vmem:[#allocation2] sm:$0xff]  ;;  %v85_v5 = vld [vmem:[#allocation2 + $0x8] sm:$0xff]  ;;  %v86_v7 = vld [vmem:[#allocation2 + $0x10] sm:$0xff]  ;;  %v314_v10 = vmov 3   ;;  %v315_v11 = vmov 1   ;;  %v316_v17 = vmov 4  }
  0x14   :  { %237 = vmatprep.subr.bf16.mxu0 %v313_v2  ;;  %43 = vperm.xlu1 %277, %v25_v3   ;;  %v238_v6 = vpack.c.bf16 %v85_v5, %v84_v4  ;;  %v87_v8 = vld [vmem:[#allocation2 + $0x18] sm:$0xff]  ;;  %v88_v12 = vld [vmem:[#allocation2 + $0x20] sm:$0xff]  ;;  %v89_v13 = vld [vmem:[#allocation2 + $0x28] sm:$0xff]  ;;  %v317_v18 = vmov 5   ;;  %v318_v22 = vmov 6   ;;  %v319_v23 = vmov 7  }
  0x15   :  { %29 = vperm.xlu0 %275, %v25_v3   ;;  %v241_v9 = vpack.c.bf16 %v87_v8, %v86_v7  ;;  %v244_v14 = vpack.c.bf16 %v89_v13, %v88_v12  ;;  %v90_v15 = vld [vmem:[#allocation2 + $0x30] sm:$0xff]  ;;  %v91_v16 = vld [vmem:[#allocation2 + $0x38] sm:$0xff]  ;;  %v92_v20 = vld [vmem:[#allocation2 + $0x40] sm:$0xff]  ;;  %vm320_vm0 = vmmov 0   ;;  %v321_v31 = vmov 0.0  }
  0x16   :  { %239 = vmatpush3.bf16.msra.mxu0 %v238_v6  ;;  %v247_v19 = vpack.c.bf16 %v91_v16, %v90_v15  ;;  %v93_v21 = vld [vmem:[#allocation2 + $0x48] sm:$0xff]  ;;  %v94_v25 = vld [vmem:[#allocation2 + $0x50] sm:$0xff]  ;;  %v95_v26 = vld [vmem:[#allocation2 + $0x58] sm:$0xff]  ;;  %234 = vmatprep.mubr.msk.f32.mxu0 %vm320_vm0, %v321_v31  ;;  %v27_v38 = vand.u32 127, %v26_v35 }
  0x17   :  { %240 = vmatprep.subr.bf16.mxu0 %v313_v2  ;;  %v250_v24 = vpack.c.bf16 %v93_v21, %v92_v20  ;;  %v253_v27 = vpack.c.bf16 %v95_v26, %v94_v25  ;;  %v96_v28 = vld [vmem:[#allocation2 + $0x60] sm:$0xff]  ;;  %v97_v29 = vld [vmem:[#allocation2 + $0x68] sm:$0xff]  ;;  %v98_v32 = vld [vmem:[#allocation2 + $0x70] sm:$0xff] }
  0x18   :  { %278 = vset.pattern.permute.xlu1 %v314_v10  ;;  %v256_v30 = vpack.c.bf16 %v97_v29, %v96_v28  ;;  %v99_v33 = vld [vmem:[#allocation2 + $0x78] sm:$0xff] }
  0x19   :  { %276 = vset.pattern.permute.xlu0 %v315_v11  ;;  %50 = vperm.xlu1 %278, %v25_v3   ;;  %v259_v34 = vpack.c.bf16 %v99_v33, %v98_v32 }
  0x1a   :  { %36 = vperm.xlu0 %276, %v25_v3   ;;  %242 = vmatpush3.bf16.msra.mxu0 %v241_v9 }
  0x1b   :  { %243 = vmatprep.subr.bf16.mxu0 %v313_v2 }
  0x1d   :  { %279 = vset.pattern.permute.xlu1 %v316_v17 }
  0x1e   :  { %280 = vset.pattern.permute.xlu0 %v317_v18  ;;  %57 = vperm.xlu1 %279, %v25_v3  }
  0x1f   :  { %64 = vperm.xlu0 %280, %v25_v3   ;;  %245 = vmatpush3.bf16.msra.mxu0 %v244_v14 }
  0x20   :  { %246 = vmatprep.subr.bf16.mxu0 %v313_v2 }
  0x22   :  { %281 = vset.pattern.permute.xlu1 %v318_v22 }
  0x23   :  { %283 = vset.pattern.permute.xlu0 %v319_v23  ;;  %71 = vperm.xlu1 %281, %v25_v3  }
  0x24   :  { %248 = vmatpush3.bf16.msra.mxu0 %v247_v19 }
  0x25   :  { %249 = vmatprep.subr.bf16.mxu0 %v313_v2 }
  0x27   :  { %282 = vset.pattern.permute.xlu1 %v319_v23 }
  0x28   :  { %251 = vmatpush3.bf16.msra.mxu0 %v250_v24  ;;  %78 = vperm.xlu1 %282, %v25_v3  }
  0x29   :  { %252 = vmatprep.subr.bf16.mxu0 %v313_v2 }
  0x2c   :  { %254 = vmatpush3.bf16.msra.mxu0 %v253_v27 }
  0x2d   :  { %255 = vmatprep.subr.bf16.mxu0 %v313_v2 }
  0x30   :  { %257 = vmatpush3.bf16.msra.mxu0 %v256_v30 }
  0x31   :  { %258 = vmatprep.subr.bf16.mxu0 %v313_v2 }
  0x34   :  { %260 = vmatpush3.bf16.msra.mxu0 %v259_v34 }
  0x93   :  { %v44_v36 = vpop.permute.xlu1 %43 }
  0x94   :  { %v30_v37 = vpop.permute.xlu0 %29  ;;  %vm45_vm2 = vcmp.eq.s32.totalorder %v44_v36, %v27_v38 }
  0x95   :  { %vm31_vm1 = vcmp.eq.s32.totalorder %v30_v37, %v27_v38  ;;  %v179_v44 = vsel %vm45_vm2, 1.0, %v321_v31 }
  0x96   :  { %v177_v41 = vsel %vm31_vm1, 1.0, %v321_v31 }
  0x98   :  { %v51_v39 = vpop.permute.xlu1 %50 }
  0x99   :  { %v37_v40 = vpop.permute.xlu0 %36  ;;  %vm52_vm4 = vcmp.eq.s32.totalorder %v51_v39, %v27_v38 }
  0x9a   :  { %vm38_vm3 = vcmp.eq.s32.totalorder %v37_v40, %v27_v38  ;;  %v180_v48 = vsel %vm52_vm4, 1.0, %v321_v31 }
  0x9b   :  { %v178_v42 = vsel %vm38_vm3, 1.0, %v321_v31 }
  0x9c   :  { %v41_v43 = vadd.f32 %v178_v42, %v177_v41 }
  0x9d   :  { %v58_v46 = vpop.permute.xlu1 %57 }
  0x9e   :  { %v48_v45 = vadd.f32 %v179_v44, %v41_v43  ;;  %v65_v47 = vpop.permute.xlu0 %64  ;;  %vm59_vm5 = vcmp.eq.s32.totalorder %v58_v46, %v27_v38 }
  0x9f   :  { %vm66_vm6 = vcmp.eq.s32.totalorder %v65_v47, %v27_v38  ;;  %v181_v50 = vsel %vm59_vm5, 1.0, %v321_v31 }
  0xa0   :  { %v55_v49 = vadd.f32 %v180_v48, %v48_v45  ;;  %v182_v52 = vsel %vm66_vm6, 1.0, %v321_v31 }
  0xa2   :  { %v62_v51 = vadd.f32 %v181_v50, %v55_v49  ;;  %v72_v53 = vpop.permute.xlu1 %71 }
  0xa3   :  { %vm73_vm7 = vcmp.eq.s32.totalorder %v72_v53, %v27_v38 }
  0xa4   :  { %v69_v54 = vadd.f32 %v182_v52, %v62_v51  ;;  %v183_v55 = vsel %vm73_vm7, 1.0, %v321_v31 }
  0xa6   :  { %v76_v57 = vadd.f32 %v183_v55, %v69_v54 }
  0xa7   :  { %v79_v56 = vpop.permute.xlu1 %78 }
  0xa8   :  { %vm80_vm8 = vcmp.eq.s32.totalorder %v79_v56, %v27_v38 }
  0xa9   :  { %v184_v58 = vsel %vm80_vm8, 1.0, %v321_v31 }
  0xaa   :  { %v83_v59 = vadd.f32 %v184_v58, %v76_v57 }
  0xac   :  { %235 = vmatmul.mubr.f32.vlgmr.msra.gmra.mrb[0].mxu0 %v83_v59 }
 0x17f   :  { %v166_v60 = vpop.f32.mrb[0].mxu0 }
 0x180   :  { %v170_v61 = vmul.f32 0.125, %v166_v60  ;;  %v236_v62 = vpop.f32.mrb[1].mxu0 }
 0x182   :  { %171 = vst [vmem:[%s365_s2] sm:$0xff] %v170_v61 }
 0x183   :  { %176 = vsyncpa [#allocation3], 1 }

</bundles_post_ra>
